<compile_context>
chip_gen: v6e
topology: v6e:2x2x1
jax: 0.10.0
libtpu: 0.0.40
codegen_flags: <defaults>
</compile_context>

<pallas_src>
import jax
import jax.numpy as jnp
from jax import lax
from jax.experimental import pallas as pl
from jax.experimental.pallas import tpu as pltpu


def gru_kernel(x_ref, wih_ref, whh_ref, bih_ref, bhh_ref, o_ref):
    # x_ref:   (T*B, F)  bf16, time-major flattened (row t*B + b)
    # wih_ref: (F, 3H)   bf16   whh_ref: (H, 3H) bf16
    # bih_ref: (1, 3H)   f32    bhh_ref: (1, 3H) f32
    # o_ref:   (B, H)    f32
    B, H = o_ref.shape
    TB = x_ref.shape[0]
    T = TB // B
    H2, H3 = 2 * H, 3 * H
    f32 = jnp.float32

    # --- Hoisted fused input projection: one matmul, b_ih folded in; kept in vregs. ---
    gi_all = jnp.dot(x_ref[...], wih_ref[...], preferred_element_type=f32) + bih_ref[...]

    # --- Loop-invariant loads / broadcasts hoisted out of the recurrence. ---
    whh = whh_ref[...]                                    # (H, 3H) bf16
    bhh = jnp.broadcast_to(bhh_ref[...], (B, H3))         # (B, 3H) f32

    # --- Sequential recurrence, h carried in vregs (f32), fully static unroll. ---
    h = jnp.zeros((B, H), f32)
    for t in range(T):
        row = t * B
        gi = gi_all[row:row + B, :]                       # (B, 3H), static slice
        gh = jnp.dot(h.astype(jnp.bfloat16), whh,
                     preferred_element_type=f32) + bhh    # single MXU pass / step
        rz = jax.nn.sigmoid(gi[:, :H2] + gh[:, :H2])      # one EUP pass for r|z
        r = rz[:, :H]
        z = rz[:, H:H2]
        n = jnp.tanh(gi[:, H2:] + r * gh[:, H2:])         # b_hn inside r*(...)
        h = (1.0 - z) * n + z * h

    o_ref[...] = h.astype(o_ref.dtype)


def gru_last_output(x_btf, w_ih, w_hh, b_ih, b_hh):
    """Equivalent of RNN.forward with bi_dir=False: returns output[:, -1, :].

    x_btf: (B, T, F) float32
    w_ih:  (3H, F), w_hh: (3H, H), b_ih/b_hh: (3H,)  -- PyTorch GRU parameter shapes
    """
    B, T, F = x_btf.shape
    H = w_hh.shape[1]
    H3 = 3 * H

    # Time-major flatten so step t owns rows [t*B, (t+1)*B); bf16 MXU operands.
    x_flat = jnp.transpose(x_btf, (1, 0, 2)).reshape(T * B, F).astype(jnp.bfloat16)
    # Fused-gate weights, pre-transposed for plain MXU matmuls: columns = [r|z|n].
    wih_fused = w_ih.T.astype(jnp.bfloat16)               # (F, 3H)
    whh_fused = w_hh.T.astype(jnp.bfloat16)               # (H, 3H)
    bih = jnp.reshape(b_ih, (1, H3)).astype(jnp.float32)
    bhh = jnp.reshape(b_hh, (1, H3)).astype(jnp.float32)

    grid_spec = pltpu.PrefetchScalarGridSpec(
        num_scalar_prefetch=0,
        grid=(1,),  # whole sequence fused into one invocation
        in_specs=[
            pl.BlockSpec((T * B, F), lambda i: (0, 0)),    # x (flattened, bf16)
            pl.BlockSpec((F, H3), lambda i: (0, 0)),       # fused W_ih^T
            pl.BlockSpec((H, H3), lambda i: (0, 0)),       # fused W_hh^T
            pl.BlockSpec((1, H3), lambda i: (0, 0)),       # fused b_ih
            pl.BlockSpec((1, H3), lambda i: (0, 0)),       # fused b_hh
        ],
        out_specs=pl.BlockSpec((B, H), lambda i: (0, 0)),
    )

    return pl.pallas_call(
        gru_kernel,
        out_shape=jax.ShapeDtypeStruct((B, H), x_btf.dtype),
        grid_spec=grid_spec,
        compiler_params=pltpu.CompilerParams(
            dimension_semantics=("arbitrary",),
            vmem_limit_bytes=32 * 1024 * 1024,
        ),
    )(x_flat, wih_fused, whh_fused, bih, bhh)


def gru_reference_f32(x_btf, w_ih, w_hh, b_ih, b_hh):
    """Pure-JAX f32 reference (lax.scan), PyTorch GRU semantics."""
    B, T, F = x_btf.shape
    H = w_hh.shape[1]
    x_tbf = jnp.transpose(x_btf, (1, 0, 2))

    def step(h, x_t):
        gi = x_t @ w_ih.T + b_ih
        gh = h @ w_hh.T + b_hh
        i_r, i_z, i_n = gi[:, :H], gi[:, H:2 * H], gi[:, 2 * H:]
        h_r, h_z, h_n = gh[:, :H], gh[:, H:2 * H], gh[:, 2 * H:]
        r = jax.nn.sigmoid(i_r + h_r)
        z = jax.nn.sigmoid(i_z + h_z)
        n = jnp.tanh(i_n + r * h_n)
        return (1.0 - z) * n + z * h, None

    h0 = jnp.zeros((B, H), jnp.float32)
    h_last, _ = lax.scan(step, h0, x_tbf)
    return h_last


def gru_reference_bf16_matmul(x_btf, w_ih, w_hh, b_ih, b_hh):
    """Reference mirroring the kernel precision: bf16 matmul operands, f32 accum/state."""
    B, T, F = x_btf.shape
    H = w_hh.shape[1]
    x_tbf = jnp.transpose(x_btf, (1, 0, 2)).astype(jnp.bfloat16)
    w_ih_t = w_ih.T.astype(jnp.bfloat16)
    w_hh_t = w_hh.T.astype(jnp.bfloat16)

    def step(h, x_t):
        gi = jnp.dot(x_t, w_ih_t, preferred_element_type=jnp.float32) + b_ih
        gh = jnp.dot(h.astype(jnp.bfloat16), w_hh_t,
                     preferred_element_type=jnp.float32) + b_hh
        i_r, i_z, i_n = gi[:, :H], gi[:, H:2 * H], gi[:, 2 * H:]
        h_r, h_z, h_n = gh[:, :H], gh[:, H:2 * H], gh[:, 2 * H:]
        r = jax.nn.sigmoid(i_r + h_r)
        z = jax.nn.sigmoid(i_z + h_z)
        n = jnp.tanh(i_n + r * h_n)
        return (1.0 - z) * n + z * h, None

    h0 = jnp.zeros((B, H), jnp.float32)
    h_last, _ = lax.scan(step, h0, x_tbf)
    return h_last


if __name__ == "__main__":
    # Small shapes consistent with the module: batch=2, seq=8, input_size=16, hidden=32
    B, T, F, H = 2, 8, 16, 32

    key = jax.random.PRNGKey(0)
    kx, k1, k2, k3, k4 = jax.random.split(key, 5)

    # Deterministic parameter init, PyTorch-style U(-1/sqrt(H), 1/sqrt(H))
    bound = 1.0 / jnp.sqrt(jnp.float32(H))
    w_ih = jax.random.uniform(k1, (3 * H, F), jnp.float32, -bound, bound)
    w_hh = jax.random.uniform(k2, (3 * H, H), jnp.float32, -bound, bound)
    b_ih = jax.random.uniform(k3, (3 * H,), jnp.float32, -bound, bound)
    b_hh = jax.random.uniform(k4, (3 * H,), jnp.float32, -bound, bound)

    x = jax.random.normal(kx, (B, T, F), jnp.float32)

    out = jax.block_until_ready(gru_last_output(x, w_ih, w_hh, b_ih, b_hh))
    assert out.shape == (B, H)

    ref_bf16 = jax.block_until_ready(gru_reference_bf16_matmul(x, w_ih, w_hh, b_ih, b_hh))
    ref_f32 = jax.block_until_ready(gru_reference_f32(x, w_ih, w_hh, b_ih, b_hh))

    assert jnp.allclose(out, ref_bf16, atol=1e-3, rtol=1e-3), "mismatch vs bf16-matmul reference"
    assert jnp.allclose(out, ref_f32, atol=5e-2, rtol=5e-2), "mismatch vs f32 reference"

    print("KERNEL_OK")
</pallas_src>

<mosaic_0001>
module attributes {stable_mosaic.version = 11 : i64} {
  func.func @gru_kernel(%arg0: i32, %arg1: memref<16x16xbf16, #tpu.memory_space<vmem>>, %arg2: memref<16x96xbf16, #tpu.memory_space<vmem>>, %arg3: memref<32x96xbf16, #tpu.memory_space<vmem>>, %arg4: memref<1x96xf32, #tpu.memory_space<vmem>>, %arg5: memref<1x96xf32, #tpu.memory_space<vmem>>, %arg6: memref<2x32xf32, #tpu.memory_space<vmem>>) attributes {dimension_semantics = [#tpu.dimension_semantics<arbitrary>], iteration_bounds = array<i64: 1>, scalar_prefetch = 0 : i64, scratch_operands = 0 : i64, tpu.core_type = #tpu.core_type<tc>, window_params = [{pipeline_mode = #tpu.pipeline_mode<synchronous>, transform_indices = @transform_0, window_bounds = array<i64: 16, 16>}, {pipeline_mode = #tpu.pipeline_mode<synchronous>, transform_indices = @transform_1, window_bounds = array<i64: 16, 96>}, {pipeline_mode = #tpu.pipeline_mode<synchronous>, transform_indices = @transform_2, window_bounds = array<i64: 32, 96>}, {pipeline_mode = #tpu.pipeline_mode<synchronous>, transform_indices = @transform_3, window_bounds = array<i64: 1, 96>}, {pipeline_mode = #tpu.pipeline_mode<synchronous>, transform_indices = @transform_4, window_bounds = array<i64: 1, 96>}, {pipeline_mode = #tpu.pipeline_mode<synchronous>, transform_indices = @transform_5, window_bounds = array<i64: 2, 32>}]} {
    %c0 = arith.constant 0 : index
    %c0_0 = arith.constant 0 : index
    %0 = vector.load %arg1[%c0, %c0_0] : memref<16x16xbf16, #tpu.memory_space<vmem>>, vector<16x16xbf16>
    %c0_1 = arith.constant 0 : index
    %c0_2 = arith.constant 0 : index
    %1 = vector.load %arg2[%c0_1, %c0_2] : memref<16x96xbf16, #tpu.memory_space<vmem>>, vector<16x96xbf16>
    %cst = arith.constant dense<0.000000e+00> : vector<16x96xf32>
    %2 = tpu.matmul %0, %1, %cst {dimension_numbers = #tpu.dot_dimension_numbers<[1], [0], [0], [1], [0, 0, 1, 1], [], []>} : vector<16x16xbf16>, vector<16x96xbf16>, vector<16x96xf32> -> vector<16x96xf32>
    %c0_3 = arith.constant 0 : index
    %c0_4 = arith.constant 0 : index
    %3 = vector.load %arg4[%c0_3, %c0_4] : memref<1x96xf32, #tpu.memory_space<vmem>>, vector<1x96xf32>
    %4 = vector.broadcast %3 : vector<1x96xf32> to vector<16x96xf32>
    %5 = arith.addf %2, %4 : vector<16x96xf32>
    %c0_5 = arith.constant 0 : index
    %c0_6 = arith.constant 0 : index
    %6 = vector.load %arg3[%c0_5, %c0_6] : memref<32x96xbf16, #tpu.memory_space<vmem>>, vector<32x96xbf16>
    %c0_7 = arith.constant 0 : index
    %c0_8 = arith.constant 0 : index
    %7 = vector.load %arg5[%c0_7, %c0_8] : memref<1x96xf32, #tpu.memory_space<vmem>>, vector<1x96xf32>
    %8 = vector.shape_cast %7 : vector<1x96xf32> to vector<1x96xf32>
    %9 = vector.broadcast %8 : vector<1x96xf32> to vector<2x96xf32>
    %cst_9 = arith.constant 0.000000e+00 : f32
    %10 = vector.broadcast %cst_9 : f32 to vector<2x32xf32>
    %11 = vector.extract_strided_slice %5 {offsets = [0, 0], sizes = [2, 96], strides = [1, 1]} : vector<16x96xf32> to vector<2x96xf32>
    %12 = arith.truncf %10 : vector<2x32xf32> to vector<2x32xbf16>
    %cst_10 = arith.constant dense<0.000000e+00> : vector<2x96xf32>
    %13 = tpu.matmul %12, %6, %cst_10 {dimension_numbers = #tpu.dot_dimension_numbers<[1], [0], [0], [1], [0, 0, 1, 1], [], []>} : vector<2x32xbf16>, vector<32x96xbf16>, vector<2x96xf32> -> vector<2x96xf32>
    %14 = arith.addf %13, %9 : vector<2x96xf32>
    %15 = vector.extract_strided_slice %11 {offsets = [0, 0], sizes = [2, 64], strides = [1, 1]} : vector<2x96xf32> to vector<2x64xf32>
    %16 = vector.extract_strided_slice %14 {offsets = [0, 0], sizes = [2, 64], strides = [1, 1]} : vector<2x96xf32> to vector<2x64xf32>
    %17 = arith.addf %15, %16 : vector<2x64xf32>
    %18 = arith.negf %17 : vector<2x64xf32>
    %19 = math.exp %18 : vector<2x64xf32>
    %cst_11 = arith.constant 1.000000e+00 : f32
    %20 = vector.broadcast %cst_11 : f32 to vector<2x64xf32>
    %21 = arith.addf %20, %19 : vector<2x64xf32>
    %22 = arith.divf %20, %21 : vector<2x64xf32>
    %23 = vector.extract_strided_slice %22 {offsets = [0, 0], sizes = [2, 32], strides = [1, 1]} : vector<2x64xf32> to vector<2x32xf32>
    %24 = vector.extract_strided_slice %22 {offsets = [0, 32], sizes = [2, 32], strides = [1, 1]} : vector<2x64xf32> to vector<2x32xf32>
    %25 = vector.extract_strided_slice %11 {offsets = [0, 64], sizes = [2, 32], strides = [1, 1]} : vector<2x96xf32> to vector<2x32xf32>
    %26 = vector.extract_strided_slice %14 {offsets = [0, 64], sizes = [2, 32], strides = [1, 1]} : vector<2x96xf32> to vector<2x32xf32>
    %27 = arith.mulf %23, %26 : vector<2x32xf32>
    %28 = arith.addf %25, %27 : vector<2x32xf32>
    %29 = math.tanh %28 : vector<2x32xf32>
    %cst_12 = arith.constant 1.000000e+00 : f32
    %30 = vector.broadcast %cst_12 : f32 to vector<2x32xf32>
    %31 = arith.subf %30, %24 : vector<2x32xf32>
    %32 = arith.mulf %31, %29 : vector<2x32xf32>
    %33 = arith.mulf %24, %10 : vector<2x32xf32>
    %34 = arith.addf %32, %33 : vector<2x32xf32>
    %35 = vector.extract_strided_slice %5 {offsets = [2, 0], sizes = [2, 96], strides = [1, 1]} : vector<16x96xf32> to vector<2x96xf32>
    %36 = arith.truncf %34 : vector<2x32xf32> to vector<2x32xbf16>
    %cst_13 = arith.constant dense<0.000000e+00> : vector<2x96xf32>
    %37 = tpu.matmul %36, %6, %cst_13 {dimension_numbers = #tpu.dot_dimension_numbers<[1], [0], [0], [1], [0, 0, 1, 1], [], []>} : vector<2x32xbf16>, vector<32x96xbf16>, vector<2x96xf32> -> vector<2x96xf32>
    %38 = arith.addf %37, %9 : vector<2x96xf32>
    %39 = vector.extract_strided_slice %35 {offsets = [0, 0], sizes = [2, 64], strides = [1, 1]} : vector<2x96xf32> to vector<2x64xf32>
    %40 = vector.extract_strided_slice %38 {offsets = [0, 0], sizes = [2, 64], strides = [1, 1]} : vector<2x96xf32> to vector<2x64xf32>
    %41 = arith.addf %39, %40 : vector<2x64xf32>
    %42 = arith.negf %41 : vector<2x64xf32>
    %43 = math.exp %42 : vector<2x64xf32>
    %cst_14 = arith.constant 1.000000e+00 : f32
    %44 = vector.broadcast %cst_14 : f32 to vector<2x64xf32>
    %45 = arith.addf %44, %43 : vector<2x64xf32>
    %46 = arith.divf %44, %45 : vector<2x64xf32>
    %47 = vector.extract_strided_slice %46 {offsets = [0, 0], sizes = [2, 32], strides = [1, 1]} : vector<2x64xf32> to vector<2x32xf32>
    %48 = vector.extract_strided_slice %46 {offsets = [0, 32], sizes = [2, 32], strides = [1, 1]} : vector<2x64xf32> to vector<2x32xf32>
    %49 = vector.extract_strided_slice %35 {offsets = [0, 64], sizes = [2, 32], strides = [1, 1]} : vector<2x96xf32> to vector<2x32xf32>
    %50 = vector.extract_strided_slice %38 {offsets = [0, 64], sizes = [2, 32], strides = [1, 1]} : vector<2x96xf32> to vector<2x32xf32>
    %51 = arith.mulf %47, %50 : vector<2x32xf32>
    %52 = arith.addf %49, %51 : vector<2x32xf32>
    %53 = math.tanh %52 : vector<2x32xf32>
    %cst_15 = arith.constant 1.000000e+00 : f32
    %54 = vector.broadcast %cst_15 : f32 to vector<2x32xf32>
    %55 = arith.subf %54, %48 : vector<2x32xf32>
    %56 = arith.mulf %55, %53 : vector<2x32xf32>
    %57 = arith.mulf %48, %34 : vector<2x32xf32>
    %58 = arith.addf %56, %57 : vector<2x32xf32>
    %59 = vector.extract_strided_slice %5 {offsets = [4, 0], sizes = [2, 96], strides = [1, 1]} : vector<16x96xf32> to vector<2x96xf32>
    %60 = arith.truncf %58 : vector<2x32xf32> to vector<2x32xbf16>
    %cst_16 = arith.constant dense<0.000000e+00> : vector<2x96xf32>
    %61 = tpu.matmul %60, %6, %cst_16 {dimension_numbers = #tpu.dot_dimension_numbers<[1], [0], [0], [1], [0, 0, 1, 1], [], []>} : vector<2x32xbf16>, vector<32x96xbf16>, vector<2x96xf32> -> vector<2x96xf32>
    %62 = arith.addf %61, %9 : vector<2x96xf32>
    %63 = vector.extract_strided_slice %59 {offsets = [0, 0], sizes = [2, 64], strides = [1, 1]} : vector<2x96xf32> to vector<2x64xf32>
    %64 = vector.extract_strided_slice %62 {offsets = [0, 0], sizes = [2, 64], strides = [1, 1]} : vector<2x96xf32> to vector<2x64xf32>
    %65 = arith.addf %63, %64 : vector<2x64xf32>
    %66 = arith.negf %65 : vector<2x64xf32>
    %67 = math.exp %66 : vector<2x64xf32>
    %cst_17 = arith.constant 1.000000e+00 : f32
    %68 = vector.broadcast %cst_17 : f32 to vector<2x64xf32>
    %69 = arith.addf %68, %67 : vector<2x64xf32>
    %70 = arith.divf %68, %69 : vector<2x64xf32>
    %71 = vector.extract_strided_slice %70 {offsets = [0, 0], sizes = [2, 32], strides = [1, 1]} : vector<2x64xf32> to vector<2x32xf32>
    %72 = vector.extract_strided_slice %70 {offsets = [0, 32], sizes = [2, 32], strides = [1, 1]} : vector<2x64xf32> to vector<2x32xf32>
    %73 = vector.extract_strided_slice %59 {offsets = [0, 64], sizes = [2, 32], strides = [1, 1]} : vector<2x96xf32> to vector<2x32xf32>
    %74 = vector.extract_strided_slice %62 {offsets = [0, 64], sizes = [2, 32], strides = [1, 1]} : vector<2x96xf32> to vector<2x32xf32>
    %75 = arith.mulf %71, %74 : vector<2x32xf32>
    %76 = arith.addf %73, %75 : vector<2x32xf32>
    %77 = math.tanh %76 : vector<2x32xf32>
    %cst_18 = arith.constant 1.000000e+00 : f32
    %78 = vector.broadcast %cst_18 : f32 to vector<2x32xf32>
    %79 = arith.subf %78, %72 : vector<2x32xf32>
    %80 = arith.mulf %79, %77 : vector<2x32xf32>
    %81 = arith.mulf %72, %58 : vector<2x32xf32>
    %82 = arith.addf %80, %81 : vector<2x32xf32>
    %83 = vector.extract_strided_slice %5 {offsets = [6, 0], sizes = [2, 96], strides = [1, 1]} : vector<16x96xf32> to vector<2x96xf32>
    %84 = arith.truncf %82 : vector<2x32xf32> to vector<2x32xbf16>
    %cst_19 = arith.constant dense<0.000000e+00> : vector<2x96xf32>
    %85 = tpu.matmul %84, %6, %cst_19 {dimension_numbers = #tpu.dot_dimension_numbers<[1], [0], [0], [1], [0, 0, 1, 1], [], []>} : vector<2x32xbf16>, vector<32x96xbf16>, vector<2x96xf32> -> vector<2x96xf32>
    %86 = arith.addf %85, %9 : vector<2x96xf32>
    %87 = vector.extract_strided_slice %83 {offsets = [0, 0], sizes = [2, 64], strides = [1, 1]} : vector<2x96xf32> to vector<2x64xf32>
    %88 = vector.extract_strided_slice %86 {offsets = [0, 0], sizes = [2, 64], strides = [1, 1]} : vector<2x96xf32> to vector<2x64xf32>
    %89 = arith.addf %87, %88 : vector<2x64xf32>
    %90 = arith.negf %89 : vector<2x64xf32>
    %91 = math.exp %90 : vector<2x64xf32>
    %cst_20 = arith.constant 1.000000e+00 : f32
    %92 = vector.broadcast %cst_20 : f32 to vector<2x64xf32>
    %93 = arith.addf %92, %91 : vector<2x64xf32>
    %94 = arith.divf %92, %93 : vector<2x64xf32>
    %95 = vector.extract_strided_slice %94 {offsets = [0, 0], sizes = [2, 32], strides = [1, 1]} : vector<2x64xf32> to vector<2x32xf32>
    %96 = vector.extract_strided_slice %94 {offsets = [0, 32], sizes = [2, 32], strides = [1, 1]} : vector<2x64xf32> to vector<2x32xf32>
    %97 = vector.extract_strided_slice %83 {offsets = [0, 64], sizes = [2, 32], strides = [1, 1]} : vector<2x96xf32> to vector<2x32xf32>
    %98 = vector.extract_strided_slice %86 {offsets = [0, 64], sizes = [2, 32], strides = [1, 1]} : vector<2x96xf32> to vector<2x32xf32>
    %99 = arith.mulf %95, %98 : vector<2x32xf32>
    %100 = arith.addf %97, %99 : vector<2x32xf32>
    %101 = math.tanh %100 : vector<2x32xf32>
    %cst_21 = arith.constant 1.000000e+00 : f32
    %102 = vector.broadcast %cst_21 : f32 to vector<2x32xf32>
    %103 = arith.subf %102, %96 : vector<2x32xf32>
    %104 = arith.mulf %103, %101 : vector<2x32xf32>
    %105 = arith.mulf %96, %82 : vector<2x32xf32>
    %106 = arith.addf %104, %105 : vector<2x32xf32>
    %107 = vector.extract_strided_slice %5 {offsets = [8, 0], sizes = [2, 96], strides = [1, 1]} : vector<16x96xf32> to vector<2x96xf32>
    %108 = arith.truncf %106 : vector<2x32xf32> to vector<2x32xbf16>
    %cst_22 = arith.constant dense<0.000000e+00> : vector<2x96xf32>
    %109 = tpu.matmul %108, %6, %cst_22 {dimension_numbers = #tpu.dot_dimension_numbers<[1], [0], [0], [1], [0, 0, 1, 1], [], []>} : vector<2x32xbf16>, vector<32x96xbf16>, vector<2x96xf32> -> vector<2x96xf32>
    %110 = arith.addf %109, %9 : vector<2x96xf32>
    %111 = vector.extract_strided_slice %107 {offsets = [0, 0], sizes = [2, 64], strides = [1, 1]} : vector<2x96xf32> to vector<2x64xf32>
    %112 = vector.extract_strided_slice %110 {offsets = [0, 0], sizes = [2, 64], strides = [1, 1]} : vector<2x96xf32> to vector<2x64xf32>
    %113 = arith.addf %111, %112 : vector<2x64xf32>
    %114 = arith.negf %113 : vector<2x64xf32>
    %115 = math.exp %114 : vector<2x64xf32>
    %cst_23 = arith.constant 1.000000e+00 : f32
    %116 = vector.broadcast %cst_23 : f32 to vector<2x64xf32>
    %117 = arith.addf %116, %115 : vector<2x64xf32>
    %118 = arith.divf %116, %117 : vector<2x64xf32>
    %119 = vector.extract_strided_slice %118 {offsets = [0, 0], sizes = [2, 32], strides = [1, 1]} : vector<2x64xf32> to vector<2x32xf32>
    %120 = vector.extract_strided_slice %118 {offsets = [0, 32], sizes = [2, 32], strides = [1, 1]} : vector<2x64xf32> to vector<2x32xf32>
    %121 = vector.extract_strided_slice %107 {offsets = [0, 64], sizes = [2, 32], strides = [1, 1]} : vector<2x96xf32> to vector<2x32xf32>
    %122 = vector.extract_strided_slice %110 {offsets = [0, 64], sizes = [2, 32], strides = [1, 1]} : vector<2x96xf32> to vector<2x32xf32>
    %123 = arith.mulf %119, %122 : vector<2x32xf32>
    %124 = arith.addf %121, %123 : vector<2x32xf32>
    %125 = math.tanh %124 : vector<2x32xf32>
    %cst_24 = arith.constant 1.000000e+00 : f32
    %126 = vector.broadcast %cst_24 : f32 to vector<2x32xf32>
    %127 = arith.subf %126, %120 : vector<2x32xf32>
    %128 = arith.mulf %127, %125 : vector<2x32xf32>
    %129 = arith.mulf %120, %106 : vector<2x32xf32>
    %130 = arith.addf %128, %129 : vector<2x32xf32>
    %131 = vector.extract_strided_slice %5 {offsets = [10, 0], sizes = [2, 96], strides = [1, 1]} : vector<16x96xf32> to vector<2x96xf32>
    %132 = arith.truncf %130 : vector<2x32xf32> to vector<2x32xbf16>
    %cst_25 = arith.constant dense<0.000000e+00> : vector<2x96xf32>
    %133 = tpu.matmul %132, %6, %cst_25 {dimension_numbers = #tpu.dot_dimension_numbers<[1], [0], [0], [1], [0, 0, 1, 1], [], []>} : vector<2x32xbf16>, vector<32x96xbf16>, vector<2x96xf32> -> vector<2x96xf32>
    %134 = arith.addf %133, %9 : vector<2x96xf32>
    %135 = vector.extract_strided_slice %131 {offsets = [0, 0], sizes = [2, 64], strides = [1, 1]} : vector<2x96xf32> to vector<2x64xf32>
    %136 = vector.extract_strided_slice %134 {offsets = [0, 0], sizes = [2, 64], strides = [1, 1]} : vector<2x96xf32> to vector<2x64xf32>
    %137 = arith.addf %135, %136 : vector<2x64xf32>
    %138 = arith.negf %137 : vector<2x64xf32>
    %139 = math.exp %138 : vector<2x64xf32>
    %cst_26 = arith.constant 1.000000e+00 : f32
    %140 = vector.broadcast %cst_26 : f32 to vector<2x64xf32>
    %141 = arith.addf %140, %139 : vector<2x64xf32>
    %142 = arith.divf %140, %141 : vector<2x64xf32>
    %143 = vector.extract_strided_slice %142 {offsets = [0, 0], sizes = [2, 32], strides = [1, 1]} : vector<2x64xf32> to vector<2x32xf32>
    %144 = vector.extract_strided_slice %142 {offsets = [0, 32], sizes = [2, 32], strides = [1, 1]} : vector<2x64xf32> to vector<2x32xf32>
    %145 = vector.extract_strided_slice %131 {offsets = [0, 64], sizes = [2, 32], strides = [1, 1]} : vector<2x96xf32> to vector<2x32xf32>
    %146 = vector.extract_strided_slice %134 {offsets = [0, 64], sizes = [2, 32], strides = [1, 1]} : vector<2x96xf32> to vector<2x32xf32>
    %147 = arith.mulf %143, %146 : vector<2x32xf32>
    %148 = arith.addf %145, %147 : vector<2x32xf32>
    %149 = math.tanh %148 : vector<2x32xf32>
    %cst_27 = arith.constant 1.000000e+00 : f32
    %150 = vector.broadcast %cst_27 : f32 to vector<2x32xf32>
    %151 = arith.subf %150, %144 : vector<2x32xf32>
    %152 = arith.mulf %151, %149 : vector<2x32xf32>
    %153 = arith.mulf %144, %130 : vector<2x32xf32>
    %154 = arith.addf %152, %153 : vector<2x32xf32>
    %155 = vector.extract_strided_slice %5 {offsets = [12, 0], sizes = [2, 96], strides = [1, 1]} : vector<16x96xf32> to vector<2x96xf32>
    %156 = arith.truncf %154 : vector<2x32xf32> to vector<2x32xbf16>
    %cst_28 = arith.constant dense<0.000000e+00> : vector<2x96xf32>
    %157 = tpu.matmul %156, %6, %cst_28 {dimension_numbers = #tpu.dot_dimension_numbers<[1], [0], [0], [1], [0, 0, 1, 1], [], []>} : vector<2x32xbf16>, vector<32x96xbf16>, vector<2x96xf32> -> vector<2x96xf32>
    %158 = arith.addf %157, %9 : vector<2x96xf32>
    %159 = vector.extract_strided_slice %155 {offsets = [0, 0], sizes = [2, 64], strides = [1, 1]} : vector<2x96xf32> to vector<2x64xf32>
    %160 = vector.extract_strided_slice %158 {offsets = [0, 0], sizes = [2, 64], strides = [1, 1]} : vector<2x96xf32> to vector<2x64xf32>
    %161 = arith.addf %159, %160 : vector<2x64xf32>
    %162 = arith.negf %161 : vector<2x64xf32>
    %163 = math.exp %162 : vector<2x64xf32>
    %cst_29 = arith.constant 1.000000e+00 : f32
    %164 = vector.broadcast %cst_29 : f32 to vector<2x64xf32>
    %165 = arith.addf %164, %163 : vector<2x64xf32>
    %166 = arith.divf %164, %165 : vector<2x64xf32>
    %167 = vector.extract_strided_slice %166 {offsets = [0, 0], sizes = [2, 32], strides = [1, 1]} : vector<2x64xf32> to vector<2x32xf32>
    %168 = vector.extract_strided_slice %166 {offsets = [0, 32], sizes = [2, 32], strides = [1, 1]} : vector<2x64xf32> to vector<2x32xf32>
    %169 = vector.extract_strided_slice %155 {offsets = [0, 64], sizes = [2, 32], strides = [1, 1]} : vector<2x96xf32> to vector<2x32xf32>
    %170 = vector.extract_strided_slice %158 {offsets = [0, 64], sizes = [2, 32], strides = [1, 1]} : vector<2x96xf32> to vector<2x32xf32>
    %171 = arith.mulf %167, %170 : vector<2x32xf32>
    %172 = arith.addf %169, %171 : vector<2x32xf32>
    %173 = math.tanh %172 : vector<2x32xf32>
    %cst_30 = arith.constant 1.000000e+00 : f32
    %174 = vector.broadcast %cst_30 : f32 to vector<2x32xf32>
    %175 = arith.subf %174, %168 : vector<2x32xf32>
    %176 = arith.mulf %175, %173 : vector<2x32xf32>
    %177 = arith.mulf %168, %154 : vector<2x32xf32>
    %178 = arith.addf %176, %177 : vector<2x32xf32>
    %179 = vector.extract_strided_slice %5 {offsets = [14, 0], sizes = [2, 96], strides = [1, 1]} : vector<16x96xf32> to vector<2x96xf32>
    %180 = arith.truncf %178 : vector<2x32xf32> to vector<2x32xbf16>
    %cst_31 = arith.constant dense<0.000000e+00> : vector<2x96xf32>
    %181 = tpu.matmul %180, %6, %cst_31 {dimension_numbers = #tpu.dot_dimension_numbers<[1], [0], [0], [1], [0, 0, 1, 1], [], []>} : vector<2x32xbf16>, vector<32x96xbf16>, vector<2x96xf32> -> vector<2x96xf32>
    %182 = arith.addf %181, %9 : vector<2x96xf32>
    %183 = vector.extract_strided_slice %179 {offsets = [0, 0], sizes = [2, 64], strides = [1, 1]} : vector<2x96xf32> to vector<2x64xf32>
    %184 = vector.extract_strided_slice %182 {offsets = [0, 0], sizes = [2, 64], strides = [1, 1]} : vector<2x96xf32> to vector<2x64xf32>
    %185 = arith.addf %183, %184 : vector<2x64xf32>
    %186 = arith.negf %185 : vector<2x64xf32>
    %187 = math.exp %186 : vector<2x64xf32>
    %cst_32 = arith.constant 1.000000e+00 : f32
    %188 = vector.broadcast %cst_32 : f32 to vector<2x64xf32>
    %189 = arith.addf %188, %187 : vector<2x64xf32>
    %190 = arith.divf %188, %189 : vector<2x64xf32>
    %191 = vector.extract_strided_slice %190 {offsets = [0, 0], sizes = [2, 32], strides = [1, 1]} : vector<2x64xf32> to vector<2x32xf32>
    %192 = vector.extract_strided_slice %190 {offsets = [0, 32], sizes = [2, 32], strides = [1, 1]} : vector<2x64xf32> to vector<2x32xf32>
    %193 = vector.extract_strided_slice %179 {offsets = [0, 64], sizes = [2, 32], strides = [1, 1]} : vector<2x96xf32> to vector<2x32xf32>
    %194 = vector.extract_strided_slice %182 {offsets = [0, 64], sizes = [2, 32], strides = [1, 1]} : vector<2x96xf32> to vector<2x32xf32>
    %195 = arith.mulf %191, %194 : vector<2x32xf32>
    %196 = arith.addf %193, %195 : vector<2x32xf32>
    %197 = math.tanh %196 : vector<2x32xf32>
    %cst_33 = arith.constant 1.000000e+00 : f32
    %198 = vector.broadcast %cst_33 : f32 to vector<2x32xf32>
    %199 = arith.subf %198, %192 : vector<2x32xf32>
    %200 = arith.mulf %199, %197 : vector<2x32xf32>
    %201 = arith.mulf %192, %178 : vector<2x32xf32>
    %202 = arith.addf %200, %201 : vector<2x32xf32>
    %c0_34 = arith.constant 0 : index
    %c0_35 = arith.constant 0 : index
    %203 = vector.load %arg6[%c0_34, %c0_35] : memref<2x32xf32, #tpu.memory_space<vmem>>, vector<2x32xf32>
    tpu.vector_store %arg6[%c0_34, %c0_35], %202 {strides = array<i32>} : memref<2x32xf32, #tpu.memory_space<vmem>>, vector<2x32xf32>,
    return
  }
  func.func @transform_0(%arg0: i32) -> (i32, i32) {
    %c0_i32 = arith.constant 0 : i32
    %c0_i32_0 = arith.constant 0 : i32
    %c0_i32_1 = arith.constant 0 : i32
    return %c0_i32, %c0_i32_0 : i32, i32
  }
  func.func @transform_1(%arg0: i32) -> (i32, i32) {
    %c0_i32 = arith.constant 0 : i32
    %c0_i32_0 = arith.constant 0 : i32
    %c0_i32_1 = arith.constant 0 : i32
    return %c0_i32, %c0_i32_0 : i32, i32
  }
  func.func @transform_2(%arg0: i32) -> (i32, i32) {
    %c0_i32 = arith.constant 0 : i32
    %c0_i32_0 = arith.constant 0 : i32
    %c0_i32_1 = arith.constant 0 : i32
    return %c0_i32, %c0_i32_0 : i32, i32
  }
  func.func @transform_3(%arg0: i32) -> (i32, i32) {
    %c0_i32 = arith.constant 0 : i32
    %c0_i32_0 = arith.constant 0 : i32
    %c0_i32_1 = arith.constant 0 : i32
    return %c0_i32, %c0_i32_0 : i32, i32
  }
  func.func @transform_4(%arg0: i32) -> (i32, i32) {
    %c0_i32 = arith.constant 0 : i32
    %c0_i32_0 = arith.constant 0 : i32
    %c0_i32_1 = arith.constant 0 : i32
    return %c0_i32, %c0_i32_0 : i32, i32
  }
  func.func @transform_5(%arg0: i32) -> (i32, i32) {
    %c0_i32 = arith.constant 0 : i32
    %c0_i32_0 = arith.constant 0 : i32
    %c0_i32_1 = arith.constant 0 : i32
    return %c0_i32, %c0_i32_0 : i32, i32
  }
}

</mosaic_0001>

<bundles_post_ra>
// kernel: tpu_custom_call.1
= control target key start
LH: loop header
LB: loop body
LE: loop exit
PB: predicated region body
PF: predicated region fallthrough
CT: control target
= control target key end

     0   :  { %10 = vsyncpa [#allocation3], 0  ;;  %s1248_s0 = inlined_call_operand.hbm [shape: bf16[16,16], index: 0, kind: input, shape index: {}]   ;;  %s1249_s1 = inlined_call_operand.hbm [shape: bf16[16,96], index: 1, kind: input, shape index: {}]   ;;  %s1250_s2 = inlined_call_operand.hbm [shape: bf16[32,96], index: 2, kind: input, shape index: {}]   ;;  %s1251_s3 = inlined_call_operand.vmem [shape: f32[1,96], index: 3, kind: input, shape index: {}]   ;;  %s1252_s4 = inlined_call_operand.vmem [shape: f32[1,96], index: 4, kind: input, shape index: {}]   ;;  %s1253_s5 = inlined_call_operand.hbm [shape: f32[2,32], index: 5, kind: output, shape index: {}]  }
   0x1   :  { %11 = vsyncpa [#allocation6], 0 }
   0x2   :  { %12 = vsyncpa [#allocation4], 0  ;;  %s1060_s18 = smov [#allocation5]   ;;  %s1061_s20 = smov [#allocation2]  }
   0x3   :  { %s30_s19 = sshll.u32 %s1060_s18, 4  ;;  %s18_s21 = sshll.u32 %s1061_s20, 4  ;;  %s31_s19 = int_to_ptr.vmem [resolvable:$true] %s30_s19  ;;  %s19_s21 = int_to_ptr.vmem [resolvable:$true] %s18_s21 }
   0x4   :  { %s982_s22 = scalar_lea.vmem %s31_s19, 128  ;;  %p987_p1 = scmp.lt.s32.totalorder %s31_s19, %s31_s19 }
   0x5   :  { %p983_p0 = scmp.ne.s32.totalorder %s31_s19, %s982_s22  ;;  %p988_p2 = scmp.lt.s32.totalorder %s982_s22, %s982_s22 }
   0x7   :  { %p989_p3 = por %p988_p2, %p987_p1 }
   0x9   :  { %p990_p4 = pnand %p989_p3, %p983_p0 }
   0xb   :  { %993 = shalt.err (!%p990_p4)
}
   0xc   :  { %s1062_s23 = smov 64   ;;  %s1063_s24 = smov 4  }
   0xd   :  { %36 = dma.hbm_to_vmem [thread:$0]  %s1249_s1, 128, %s31_s19, [#allocation6], %s1062_s23, %s1062_s23, %s1063_s24  }
   0xe   :  { %s1002_s27 = scalar_lea.vmem %s19_s21, 128  ;;  %p1007_p6 = scmp.lt.s32.totalorder %s19_s21, %s19_s21 }
   0xf   :  { %p1003_p5 = scmp.ne.s32.totalorder %s19_s21, %s1002_s27  ;;  %p1008_p7 = scmp.lt.s32.totalorder %s1002_s27, %s1002_s27 }
  0x11   :  { %p1009_p8 = por %p1008_p7, %p1007_p6 }
  0x13   :  { %p1010_p9 = pnand %p1009_p8, %p1003_p5 }
  0x15   :  { %1013 = shalt.err (!%p1010_p9)
}
  0x16   :  { %24 = dma.hbm_to_vmem [thread:$0]  %s1248_s0, 128, %s19_s21, [#allocation3], %s1062_s23, %s1062_s23, %s1063_s24  }
  0x17   :  { %s1064_s30 = smov [#allocation7]  }
  0x18   :  { %s42_s6 = sshll.u32 %s1064_s30, 4  ;;  %s43_s6 = int_to_ptr.vmem [resolvable:$true] %s42_s6 }
  0x19   :  { %s1022_s7 = scalar_lea.vmem %s43_s6, 256  ;;  %p1027_p11 = scmp.lt.s32.totalorder %s43_s6, %s43_s6 }
  0x1a   :  { %p1023_p10 = scmp.ne.s32.totalorder %s43_s6, %s1022_s7  ;;  %p1028_p12 = scmp.lt.s32.totalorder %s1022_s7, %s1022_s7 }
  0x1c   :  { %p1029_p13 = por %p1028_p12, %p1027_p11 }
  0x1e   :  { %p1030_p0 = pnand %p1029_p13, %p1023_p10 }
  0x20   :  { %1033 = shalt.err (!%p1030_p0)
}
  0x21   :  { %48 = dma.hbm_to_vmem [thread:$0]  %s1250_s2, 256, %s43_s6, [#allocation6], %s1062_s23, %s1062_s23, %s1063_s24  }
  0x22   :  { %1054 = dma.done.wait [#allocation3], 128  }
  0x23   :  { %1055 = vsyncadd [#allocation3], 4294967168 }
  0x24   :  { %1056 = dma.done.wait [#allocation6], 384  }
  0x25   :  { %1057 = vsyncadd [#allocation6], 4294966912  ;;  %v1065_v0 = vmov 0.0   ;;  %vm1066_vm0 = vmmov 0   ;;  %v1121_v1 = vld [vmem:[#allocation7 + $0x8] sm:$0xff]   ;;  %v923_v2 = vld [vmem:[#allocation5] sm:$0xff]  }
  0x26   :  { %848 = vmatprep.subr.bf16.mxu1 %v1065_v0  ;;  %842 = vmatprep.subr.bf16.mxu0 %v1065_v0  ;;  %v1124_v3 = vld [vmem:[#allocation7] sm:$0xff]   ;;  %v925_v4 = vld [vmem:[#allocation2] sm:$0xff]   ;;  %vm85_vm1 = vcmask 130048   ;;  %v1067_v5 = vmov 0   ;;  %vm153_vm2 = vcmask 261120   ;;  %vm776_vm3 = vcmask 261126  }
  0x27   :  { %844 = vmatprep.mubr.msk.bf16.mxu0 %vm1066_vm0, %v1065_v0  ;;  %852 = vmatprep.mubr.msk.bf16.mxu1 %vm1066_vm0, %v1065_v0  ;;  %v1145_v7 = vld [vmem:[%s1252_s4] ss:$0 sm:$0xff]  ;;  %s1069_s4 = smov [#allocation8]  }
  0x28   :  { %849 = vmatpush3.bf16.msra.mxu1 %v1121_v1  ;;  %843 = vmatpush3.bf16.msra.mxu0 %v923_v2  ;;  %v794_v10 = vld [vmem:[%s1251_s3] ss:$0 sm:$0xff]  ;;  %s1068_s3 = smov 96   ;;  %s784_s11 = sshll.u32 %s1069_s4, 4  ;;  %s785_s11 = int_to_ptr.vmem [resolvable:$true] %s784_s11 }
  0x29   :  { %850 = vmatprep.subr.bf16.mxu1 %v1065_v0  ;;  %856 = vmatprep.subr.bf16.mxu0 %v1065_v0  ;;  %s1034_s12 = scalar_lea.vmem %s785_s11, 32  ;;  %p1039_p2 = scmp.lt.s32.totalorder %s785_s11, %s785_s11 }
  0x2a   :  { %p1035_p1 = scmp.ne.s32.totalorder %s785_s11, %s1034_s12  ;;  %p1040_p3 = scmp.lt.s32.totalorder %s1034_s12, %s1034_s12 }
  0x2b   :  { %845 = vmatmul.mubr.msk.bf16.vlgmr.msra.gmra.mxu0 %vm85_vm1, %v925_v4 }
  0x2c   :  { %851 = vmatpush3.bf16.msra.mxu1 %v1124_v3  ;;  %857 = vmatpush3.bf16.msra.mxu0 %v1121_v1  ;;  %p1041_p4 = por %p1040_p3, %p1039_p2 }
  0x2d   :  { %860 = vmatprep.mubr.msk.bf16.mxu0 %vm1066_vm0, %v1065_v0  ;;  %858 = vmatprep.subr.bf16.mxu0 %v1065_v0 }
  0x2e   :  { %864 = vmatprep.subr.bf16.mxu1 %v1065_v0  ;;  %p1042_p5 = pnand %p1041_p4, %p1035_p1 }
  0x2f   :  { %853 = vmatmul.mubr.bf16.vlgmr.msra.gmra.mxu1 %v1067_v5 }
  0x30   :  { %865 = vmatpush3.bf16.msra.mxu1 %v1121_v1  ;;  %868 = vmatprep.mubr.msk.bf16.mxu1 %vm1066_vm0, %v1065_v0 }
  0x31   :  { %859 = vmatpush3.bf16.msra.mxu0 %v1124_v3  ;;  %866 = vmatprep.subr.bf16.mxu1 %v1065_v0 }
  0x32   :  { %872 = vmatprep.subr.bf16.mxu0 %v1065_v0 }
  0x34   :  { %867 = vmatpush3.bf16.msra.mxu1 %v1124_v3 }
  0x35   :  { %880 = vmatprep.subr.bf16.mxu1 %v1065_v0 }
  0xeb   :  { %v123_v6 = vpop.f32.mrf.mxu0 }
  0xec   :  { %v1154_v18 = vadd.f32 %v794_v10, %v123_v6 }
  0xed   :  { %v846_v8 = vpop.f32.mrf.mxu0 }
  0xef   :  { %v191_v9 = vpop.f32.mrf.mxu1  ;;  %v126_v12 = vpop.f32.mrf.mxu0 }
  0xf0   :  { %v192_v11 = vadd.f32 %v1145_v7, %v191_v9  ;;  %v1151_v14 = vadd.f32 %v794_v10, %v126_v12 }
  0xf1   :  { %v854_v13 = vpop.f32.mrf.mxu1  ;;  %v847_v15 = vpop.f32.mrf.mxu0 }
  0xf2   :  { %205 = vrot.lane.b32.xlu0 %v192_v11, %s1062_s23  ;;  %v197_v19 = vadd.f32 %v192_v11, %v1154_v18 }
  0xf3   :  { %v194_v16 = vpop.f32.mrf.mxu1 }
  0xf4   :  { %v801_v20 = vmul.f32 -1.442695, %v197_v19 }
  0xf5   :  { %v855_v17 = vpop.f32.mrf.mxu1 }
  0xf6   :  { %926 = vpow2.f32 %v801_v20 }
 0x103   :  { %v927_v21 = vpop.eup %926 }
 0x104   :  { %v201_v22 = vadd.f32 1.0, %v927_v21 }
 0x106   :  { %928 = vrcp.f32 %v201_v22 }
 0x113   :  { %v929_v23 = vpop.eup %928 }
 0x114   :  { %v215_v29 = vsub.f32 1.0, %v929_v23  ;;  %v221_v31 = vmul.f32 0.0, %v929_v23 }
 0x164   :  { %v206_v24 = vpop.permute.xlu0 %205 }
 0x165   :  { %v208_v25 = vmul.f32 %v929_v23, %v206_v24 }
 0x167   :  { %210 = vrot.lane.b32.xlu0 %v208_v25, %s1062_s23 }
 0x1d9   :  { %v211_v26 = vpop.permute.xlu0 %210 }
 0x1da   :  { %v213_v27 = vadd.f32 %v211_v26, %v1154_v18 }
 0x1dc   :  { %930 = vtanh.f32 %v213_v27 }
 0x1e9   :  { %v931_v28 = vpop.eup %930 }
 0x1ea   :  { %217 = vrot.lane.b32.xlu1 %v931_v28, %s1068_s3 }
 0x25c   :  { %v218_v30 = vpop.permute.xlu1 %217 }
 0x25d   :  { %v220_v32 = vmul.f32 %v218_v30, %v215_v29 }
 0x25f   :  { %v222_v33 = vadd.f32 %v221_v31, %v220_v32 }
 0x261   :  { %v223_v34 = vpack.c.bf16 %v222_v33, %v222_v33  ;;  %v297_v52 = vrot.slane %v222_v33, 6 }
 0x263   :  { %225 = vrot.lane.b32.xlu1 %v223_v34, %s1068_s3 }
 0x2d5   :  { %v226_v35 = vpop.permute.xlu1 %225 }
 0x2d6   :  { %861 = vmatmul.mubr.msk.bf16.vlgmr.msra.gmra.mxu0 %vm153_vm2, %v226_v35 }
 0x2d7   :  { %873 = vmatpush3.bf16.msra.mxu0 %v1121_v1  ;;  %876 = vmatprep.mubr.msk.bf16.mxu0 %vm1066_vm0, %v1065_v0 }
 0x2d8   :  { %874 = vmatprep.subr.bf16.mxu0 %v1065_v0 }
 0x2db   :  { %875 = vmatpush3.bf16.msra.mxu0 %v1124_v3 }
 0x2dc   :  { %888 = vmatprep.subr.bf16.mxu0 %v1065_v0 }
 0x396   :  { %v264_v36 = vpop.f32.mrf.mxu0 }
 0x397   :  { %v265_v37 = vadd.f32 %v1145_v7, %v264_v36 }
 0x398   :  { %v862_v38 = vpop.f32.mrf.mxu0 }
 0x399   :  { %v271_v39 = vrot.slane %v265_v37, 6 }
 0x39a   :  { %v267_v40 = vpop.f32.mrf.mxu0 }
 0x39b   :  { %280 = vrot.lane.b32.xlu0 %v271_v39, %s1062_s23  ;;  %v273_v42 = vadd.f32 %v271_v39, %v1154_v18 }
 0x39c   :  { %v863_v41 = vpop.f32.mrf.mxu0 }
 0x39d   :  { %v803_v43 = vmul.f32 -1.442695, %v273_v42 }
 0x39f   :  { %932 = vpow2.f32 %v803_v43 }
 0x3ac   :  { %v933_v44 = vpop.eup %932 }
 0x3ad   :  { %v277_v45 = vadd.f32 1.0, %v933_v44 }
 0x3af   :  { %934 = vrcp.f32 %v277_v45 }
 0x3bc   :  { %v935_v46 = vpop.eup %934 }
 0x3bd   :  { %v290_v53 = vsub.f32 1.0, %v935_v46  ;;  %v299_v55 = vmul.f32 %v935_v46, %v297_v52 }
 0x40d   :  { %v281_v47 = vpop.permute.xlu0 %280 }
 0x40e   :  { %v283_v48 = vmul.f32 %v935_v46, %v281_v47 }
 0x410   :  { %285 = vrot.lane.b32.xlu1 %v283_v48, %s1062_s23 }
 0x482   :  { %v286_v49 = vpop.permute.xlu1 %285 }
 0x483   :  { %v288_v50 = vadd.f32 %v286_v49, %v1154_v18 }
 0x485   :  { %936 = vtanh.f32 %v288_v50 }
 0x492   :  { %v937_v51 = vpop.eup %936 }
 0x493   :  { %292 = vrot.lane.b32.xlu0 %v937_v51, %s1068_s3 }
 0x505   :  { %v293_v54 = vpop.permute.xlu0 %292 }
 0x506   :  { %v295_v56 = vmul.f32 %v293_v54, %v290_v53 }
 0x508   :  { %v300_v57 = vadd.f32 %v299_v55, %v295_v56 }
 0x50a   :  { %v301_v58 = vpack.c.bf16 %v300_v57, %v300_v57  ;;  %v376_v19 = vrot.slane %v300_v57, 6 }
 0x50c   :  { %v303_v59 = vrot.slane %v301_v58, 1 }
 0x50e   :  { %304 = vrot.lane.b32.xlu1 %v303_v59, %s1068_s3 }
 0x580   :  { %v305_v60 = vpop.permute.xlu1 %304 }
 0x581   :  { %869 = vmatmul.mubr.msk.bf16.vlgmr.msra.gmra.mxu1 %vm153_vm2, %v305_v60 }
 0x582   :  { %881 = vmatpush3.bf16.msra.mxu1 %v1121_v1  ;;  %884 = vmatprep.mubr.msk.bf16.mxu1 %vm1066_vm0, %v1065_v0 }
 0x583   :  { %882 = vmatprep.subr.bf16.mxu1 %v1065_v0 }
 0x586   :  { %883 = vmatpush3.bf16.msra.mxu1 %v1124_v3 }
 0x587   :  { %896 = vmatprep.subr.bf16.mxu1 %v1065_v0 }
 0x641   :  { %v343_v61 = vpop.f32.mrf.mxu1 }
 0x642   :  { %v344_v62 = vadd.f32 %v1145_v7, %v343_v61 }
 0x643   :  { %v870_v63 = vpop.f32.mrf.mxu1 }
 0x644   :  { %v350_v2 = vrot.slane %v344_v62, 4 }
 0x645   :  { %v346_v4 = vpop.f32.mrf.mxu1 }
 0x646   :  { %359 = vrot.lane.b32.xlu0 %v350_v2, %s1062_s23  ;;  %v352_v6 = vadd.f32 %v350_v2, %v1154_v18 }
 0x647   :  { %v871_v5 = vpop.f32.mrf.mxu1 }
 0x648   :  { %v805_v8 = vmul.f32 -1.442695, %v352_v6 }
 0x64a   :  { %938 = vpow2.f32 %v805_v8 }
 0x657   :  { %v939_v9 = vpop.eup %938 }
 0x658   :  { %v356_v10 = vadd.f32 1.0, %v939_v9 }
 0x65a   :  { %940 = vrcp.f32 %v356_v10 }
 0x667   :  { %v941_v11 = vpop.eup %940 }
 0x668   :  { %v369_v20 = vsub.f32 1.0, %v941_v11  ;;  %v378_v22 = vmul.f32 %v941_v11, %v376_v19 }
 0x6b8   :  { %v360_v12 = vpop.permute.xlu0 %359 }
 0x6b9   :  { %v362_v13 = vmul.f32 %v941_v11, %v360_v12 }
 0x6bb   :  { %364 = vrot.lane.b32.xlu1 %v362_v13, %s1062_s23 }
 0x72d   :  { %v365_v15 = vpop.permute.xlu1 %364 }
 0x72e   :  { %v367_v16 = vadd.f32 %v365_v15, %v1154_v18 }
 0x730   :  { %942 = vtanh.f32 %v367_v16 }
 0x73d   :  { %v943_v17 = vpop.eup %942 }
 0x73e   :  { %371 = vrot.lane.b32.xlu0 %v943_v17, %s1068_s3 }
 0x7b0   :  { %v372_v21 = vpop.permute.xlu0 %371 }
 0x7b1   :  { %v374_v23 = vmul.f32 %v372_v21, %v369_v20 }
 0x7b3   :  { %v379_v24 = vadd.f32 %v378_v22, %v374_v23 }
 0x7b5   :  { %v380_v25 = vpack.c.bf16 %v379_v24, %v379_v24  ;;  %v455_v44 = vrot.slane %v379_v24, 6 }
 0x7b7   :  { %v382_v26 = vrot.slane %v380_v25, 2 }
 0x7b9   :  { %383 = vrot.lane.b32.xlu1 %v382_v26, %s1068_s3 }
 0x82b   :  { %v384_v27 = vpop.permute.xlu1 %383 }
 0x82c   :  { %877 = vmatmul.mubr.msk.bf16.vlgmr.msra.gmra.mxu0 %vm153_vm2, %v384_v27 }
 0x82d   :  { %889 = vmatpush3.bf16.msra.mxu0 %v1121_v1  ;;  %892 = vmatprep.mubr.msk.bf16.mxu0 %vm1066_vm0, %v1065_v0 }
 0x82e   :  { %890 = vmatprep.subr.bf16.mxu0 %v1065_v0 }
 0x831   :  { %891 = vmatpush3.bf16.msra.mxu0 %v1124_v3 }
 0x832   :  { %904 = vmatprep.subr.bf16.mxu0 %v1065_v0 }
 0x8ec   :  { %v422_v28 = vpop.f32.mrf.mxu0 }
 0x8ed   :  { %v423_v29 = vadd.f32 %v1145_v7, %v422_v28 }
 0x8ee   :  { %v878_v30 = vpop.f32.mrf.mxu0 }
 0x8ef   :  { %v429_v31 = vrot.slane %v423_v29, 2 }
 0x8f0   :  { %v425_v32 = vpop.f32.mrf.mxu0 }
 0x8f1   :  { %438 = vrot.lane.b32.xlu0 %v429_v31, %s1062_s23  ;;  %v431_v34 = vadd.f32 %v429_v31, %v1154_v18 }
 0x8f2   :  { %v879_v33 = vpop.f32.mrf.mxu0 }
 0x8f3   :  { %v807_v35 = vmul.f32 -1.442695, %v431_v34 }
 0x8f5   :  { %944 = vpow2.f32 %v807_v35 }
 0x902   :  { %v945_v36 = vpop.eup %944 }
 0x903   :  { %v435_v37 = vadd.f32 1.0, %v945_v36 }
 0x905   :  { %946 = vrcp.f32 %v435_v37 }
 0x912   :  { %v947_v38 = vpop.eup %946 }
 0x913   :  { %v448_v45 = vsub.f32 1.0, %v947_v38  ;;  %v457_v47 = vmul.f32 %v947_v38, %v455_v44 }
 0x963   :  { %v439_v39 = vpop.permute.xlu0 %438 }
 0x964   :  { %v441_v40 = vmul.f32 %v947_v38, %v439_v39 }
 0x966   :  { %443 = vrot.lane.b32.xlu1 %v441_v40, %s1062_s23 }
 0x9d8   :  { %v444_v41 = vpop.permute.xlu1 %443 }
 0x9d9   :  { %v446_v42 = vadd.f32 %v444_v41, %v1154_v18 }
 0x9db   :  { %948 = vtanh.f32 %v446_v42 }
 0x9e8   :  { %v949_v43 = vpop.eup %948 }
 0x9e9   :  { %450 = vrot.lane.b32.xlu0 %v949_v43, %s1068_s3 }
 0xa5b   :  { %v451_v46 = vpop.permute.xlu0 %450 }
 0xa5c   :  { %v453_v48 = vmul.f32 %v451_v46, %v448_v45 }
 0xa5e   :  { %v458_v49 = vadd.f32 %v457_v47, %v453_v48 }
 0xa60   :  { %v459_v50 = vpack.c.bf16 %v458_v49, %v458_v49  ;;  %v532_v6 = vrot.slane %v458_v49, 6 }
 0xa62   :  { %v461_v51 = vrot.slane %v459_v50, 3 }
 0xa64   :  { %462 = vrot.lane.b32.xlu1 %v461_v51, %s1068_s3 }
 0xad6   :  { %v463_v52 = vpop.permute.xlu1 %462 }
 0xad7   :  { %885 = vmatmul.mubr.msk.bf16.vlgmr.msra.gmra.mxu1 %vm153_vm2, %v463_v52 }
 0xad8   :  { %897 = vmatpush3.bf16.msra.mxu1 %v1121_v1  ;;  %900 = vmatprep.mubr.msk.bf16.mxu1 %vm1066_vm0, %v1065_v0 }
 0xad9   :  { %898 = vmatprep.subr.bf16.mxu1 %v1065_v0 }
 0xadc   :  { %899 = vmatpush3.bf16.msra.mxu1 %v1124_v3 }
 0xb97   :  { %v501_v18 = vpop.f32.mrf.mxu1 }
 0xb98   :  { %v502_v53 = vadd.f32 %v1145_v7, %v501_v18 }
 0xb99   :  { %v886_v54 = vpop.f32.mrf.mxu1 }
 0xb9a   :  { %515 = vrot.lane.b32.xlu0 %v502_v53, %s1062_s23  ;;  %v507_v57 = vadd.f32 %v502_v53, %v1151_v14 }
 0xb9b   :  { %v504_v55 = vpop.f32.mrf.mxu1 }
 0xb9c   :  { %v809_v58 = vmul.f32 -1.442695, %v507_v57 }
 0xb9d   :  { %v887_v56 = vpop.f32.mrf.mxu1 }
 0xb9e   :  { %950 = vpow2.f32 %v809_v58 }
 0xbab   :  { %v951_v59 = vpop.eup %950 }
 0xbac   :  { %v511_v60 = vadd.f32 1.0, %v951_v59 }
 0xbae   :  { %952 = vrcp.f32 %v511_v60 }
 0xbbb   :  { %v953_v61 = vpop.eup %952 }
 0xbbc   :  { %v525_v8 = vsub.f32 1.0, %v953_v61  ;;  %v534_v10 = vmul.f32 %v953_v61, %v532_v6 }
 0xc0c   :  { %v516_v62 = vpop.permute.xlu0 %515 }
 0xc0d   :  { %v518_v63 = vmul.f32 %v953_v61, %v516_v62 }
 0xc0f   :  { %520 = vrot.lane.b32.xlu1 %v518_v63, %s1062_s23 }
 0xc81   :  { %v521_v2 = vpop.permute.xlu1 %520 }
 0xc82   :  { %v523_v4 = vadd.f32 %v521_v2, %v1151_v14 }
 0xc84   :  { %954 = vtanh.f32 %v523_v4 }
 0xc91   :  { %v955_v5 = vpop.eup %954 }
 0xc92   :  { %527 = vrot.lane.b32.xlu0 %v955_v5, %s1068_s3 }
 0xd04   :  { %v528_v9 = vpop.permute.xlu0 %527 }
 0xd05   :  { %v530_v11 = vmul.f32 %v528_v9, %v525_v8 }
 0xd07   :  { %v535_v12 = vadd.f32 %v534_v10, %v530_v11 }
 0xd09   :  { %v536_v13 = vpack.c.bf16 %v535_v12, %v535_v12  ;;  %v610_v30 = vrot.slane %v535_v12, 6 }
 0xd0b   :  { %538 = vrot.lane.b32.xlu1 %v536_v13, %s1068_s3 }
 0xd7d   :  { %v539_v15 = vpop.permute.xlu1 %538 }
 0xd7e   :  { %893 = vmatmul.mubr.msk.bf16.vlgmr.msra.gmra.mxu0 %vm153_vm2, %v539_v15 }
 0xd7f   :  { %905 = vmatpush3.bf16.msra.mxu0 %v1121_v1  ;;  %908 = vmatprep.mubr.msk.bf16.mxu0 %vm1066_vm0, %v1065_v0 }
 0xd80   :  { %906 = vmatprep.subr.bf16.mxu0 %v1065_v0 }
 0xd83   :  { %907 = vmatpush3.bf16.msra.mxu0 %v1124_v3 }
 0xe3e   :  { %v577_v16 = vpop.f32.mrf.mxu0 }
 0xe3f   :  { %v578_v17 = vadd.f32 %v1145_v7, %v577_v16 }
 0xe40   :  { %v894_v19 = vpop.f32.mrf.mxu0 }
 0xe41   :  { %v584_v20 = vrot.slane %v578_v17, 6 }
 0xe42   :  { %v580_v21 = vpop.f32.mrf.mxu0 }
 0xe43   :  { %593 = vrot.lane.b32.xlu0 %v584_v20, %s1062_s23  ;;  %v586_v23 = vadd.f32 %v584_v20, %v1151_v14 }
 0xe44   :  { %v895_v22 = vpop.f32.mrf.mxu0 }
 0xe45   :  { %v811_v24 = vmul.f32 -1.442695, %v586_v23 }
 0xe47   :  { %956 = vpow2.f32 %v811_v24 }
 0xe54   :  { %v957_v1 = vpop.eup %956 }
 0xe55   :  { %v590_v25 = vadd.f32 1.0, %v957_v1 }
 0xe57   :  { %958 = vrcp.f32 %v590_v25 }
 0xe64   :  { %v959_v26 = vpop.eup %958 }
 0xe65   :  { %v603_v31 = vsub.f32 1.0, %v959_v26  ;;  %v612_v33 = vmul.f32 %v959_v26, %v610_v30 }
 0xeb5   :  { %v594_v0 = vpop.permute.xlu0 %593 }
 0xeb6   :  { %v596_v27 = vmul.f32 %v959_v26, %v594_v0 }
 0xeb8   :  { %598 = vrot.lane.b32.xlu1 %v596_v27, %s1062_s23 }
 0xf2a   :  { %v599_v3 = vpop.permute.xlu1 %598 }
 0xf2b   :  { %v601_v28 = vadd.f32 %v599_v3, %v1151_v14 }
 0xf2d   :  { %960 = vtanh.f32 %v601_v28 }
 0xf3a   :  { %v961_v29 = vpop.eup %960 }
 0xf3b   :  { %605 = vrot.lane.b32.xlu0 %v961_v29, %s1068_s3 }
 0xfad   :  { %v606_v32 = vpop.permute.xlu0 %605 }
 0xfae   :  { %v608_v34 = vmul.f32 %v606_v32, %v603_v31 }
 0xfb0   :  { %v613_v35 = vadd.f32 %v612_v33, %v608_v34 }
 0xfb2   :  { %v614_v36 = vpack.c.bf16 %v613_v35, %v613_v35  ;;  %v689_v54 = vrot.slane %v613_v35, 6 }
 0xfb4   :  { %v616_v37 = vrot.slane %v614_v36, 1 }
 0xfb6   :  { %617 = vrot.lane.b32.xlu1 %v616_v37, %s1068_s3 }
0x1028   :  { %v618_v38 = vpop.permute.xlu1 %617 }
0x1029   :  { %901 = vmatmul.mubr.msk.bf16.vlgmr.msra.gmra.mxu1 %vm153_vm2, %v618_v38 }
0x10e9   :  { %v656_v39 = vpop.f32.mrf.mxu1 }
0x10ea   :  { %v657_v40 = vadd.f32 %v1145_v7, %v656_v39 }
0x10eb   :  { %v902_v41 = vpop.f32.mrf.mxu1 }
0x10ec   :  { %v663_v42 = vrot.slane %v657_v40, 4 }
0x10ed   :  { %v659_v43 = vpop.f32.mrf.mxu1 }
0x10ee   :  { %672 = vrot.lane.b32.xlu0 %v663_v42, %s1062_s23  ;;  %v665_v45 = vadd.f32 %v663_v42, %v1151_v14 }
0x10ef   :  { %v903_v44 = vpop.f32.mrf.mxu1 }
0x10f0   :  { %v813_v46 = vmul.f32 -1.442695, %v665_v45 }
0x10f2   :  { %962 = vpow2.f32 %v813_v46 }
0x10ff   :  { %v963_v47 = vpop.eup %962 }
0x1100   :  { %v669_v48 = vadd.f32 1.0, %v963_v47 }
0x1102   :  { %964 = vrcp.f32 %v669_v48 }
0x110f   :  { %v965_v49 = vpop.eup %964 }
0x1110   :  { %v682_v55 = vsub.f32 1.0, %v965_v49  ;;  %v691_v57 = vmul.f32 %v965_v49, %v689_v54 }
0x1160   :  { %v673_v50 = vpop.permute.xlu0 %672 }
0x1161   :  { %v675_v51 = vmul.f32 %v965_v49, %v673_v50 }
0x1163   :  { %677 = vrot.lane.b32.xlu1 %v675_v51, %s1062_s23 }
0x11d5   :  { %v678_v52 = vpop.permute.xlu1 %677 }
0x11d6   :  { %v680_v18 = vadd.f32 %v678_v52, %v1151_v14 }
0x11d8   :  { %966 = vtanh.f32 %v680_v18 }
0x11e5   :  { %v967_v53 = vpop.eup %966 }
0x11e6   :  { %684 = vrot.lane.b32.xlu0 %v967_v53, %s1068_s3 }
0x1258   :  { %v685_v56 = vpop.permute.xlu0 %684 }
0x1259   :  { %v687_v58 = vmul.f32 %v685_v56, %v682_v55 }
0x125b   :  { %v692_v59 = vadd.f32 %v691_v57, %v687_v58 }
0x125d   :  { %v693_v60 = vpack.c.bf16 %v692_v59, %v692_v59  ;;  %v768_v20 = vrot.slane %v692_v59, 6 }
0x125f   :  { %v695_v61 = vrot.slane %v693_v60, 2 }
0x1261   :  { %696 = vrot.lane.b32.xlu1 %v695_v61, %s1068_s3 }
0x12d3   :  { %v697_v62 = vpop.permute.xlu1 %696 }
0x12d4   :  { %909 = vmatmul.mubr.msk.bf16.vlgmr.msra.gmra.mxu0 %vm153_vm2, %v697_v62 }
0x1394   :  { %v735_v63 = vpop.f32.mrf.mxu0 }
0x1395   :  { %v736_v2 = vadd.f32 %v1145_v7, %v735_v63 }
0x1396   :  { %v910_v4 = vpop.f32.mrf.mxu0 }
0x1397   :  { %v742_v5 = vrot.slane %v736_v2, 2 }
0x1398   :  { %v738_v6 = vpop.f32.mrf.mxu0 }
0x1399   :  { %751 = vrot.lane.b32.xlu0 %v742_v5, %s1062_s23  ;;  %v744_v9 = vadd.f32 %v742_v5, %v1151_v14 }
0x139a   :  { %v911_v8 = vpop.f32.mrf.mxu0 }
0x139b   :  { %v815_v10 = vmul.f32 -1.442695, %v744_v9 }
0x139d   :  { %968 = vpow2.f32 %v815_v10 }
0x13aa   :  { %v969_v11 = vpop.eup %968 }
0x13ab   :  { %v748_v12 = vadd.f32 1.0, %v969_v11 }
0x13ad   :  { %970 = vrcp.f32 %v748_v12 }
0x13ba   :  { %v971_v13 = vpop.eup %970 }
0x13bb   :  { %v761_v21 = vsub.f32 1.0, %v971_v13  ;;  %v770_v23 = vmul.f32 %v971_v13, %v768_v20 }
0x140b   :  { %v752_v15 = vpop.permute.xlu0 %751 }
0x140c   :  { %v754_v16 = vmul.f32 %v971_v13, %v752_v15 }
0x140e   :  { %756 = vrot.lane.b32.xlu1 %v754_v16, %s1062_s23 }
0x1480   :  { %v757_v17 = vpop.permute.xlu1 %756 }
0x1481   :  { %v759_v7 = vadd.f32 %v757_v17, %v1151_v14 }
0x1483   :  { %972 = vtanh.f32 %v759_v7 }
0x1490   :  { %v973_v19 = vpop.eup %972 }
0x1491   :  { %763 = vrot.lane.b32.xlu0 %v973_v19, %s1068_s3 }
0x1503   :  { %v764_v22 = vpop.permute.xlu0 %763 }
0x1504   :  { %v766_v24 = vmul.f32 %v764_v22, %v761_v21 }
0x1506   :  { %v771_v1 = vadd.f32 %v770_v23, %v766_v24 }
0x1508   :  { %773 = vrot.lane.b32.xlu1 %v771_v1, %s1068_s3 }
0x157a   :  { %v774_v25 = vpop.permute.xlu1 %773 }
0x157b   :  { %777 = vst.msk [vmem:[#allocation8 - $0x6] sm:$0xc0] %vm776_vm3, %v774_v25 }
0x157c   :  { %1045 = shalt.err (!%p1042_p5)
}
0x157d   :  { %787 = dma.vmem_to_hbm [thread:$0]  %s785_s11, 32, %s1253_s5, [#allocation4]  }
0x157e   :  { %1058 = dma.done.wait [#allocation4], 32  }
0x157f   :  { %1059 = vsyncadd [#allocation4], 4294967264 }
0x1580   :  { %791 = vsyncpa [#allocation3], 1 }
0x1581   :  { %792 = vsyncpa [#allocation6], 1 }
0x1582   :  { %793 = vsyncpa [#allocation4], 1 }

</bundles_post_ra>
